<compile_context>
chip_gen: v5e
topology: v5e:2x2
jax: 0.10.0
libtpu: 0.0.40
codegen_flags: <defaults>
</compile_context>

<pallas_src>
import jax
import jax.numpy as jnp
from jax.experimental import pallas as pl
from jax.experimental.pallas import tpu as pltpu

_LANE = 128  # TPU lane width; fc2's 1-wide output is padded to this.


def mlp_d_kernel(x_ref, att_ref, w1x_ref, w1a_ref, b1_ref, w2_ref, b2_ref, out_ref):
    # x_ref:   (tm, resSize)  f32      w1x_ref: (resSize, ndh)  bf16
    # att_ref: (tm, attSize)  f32      w1a_ref: (attSize, ndh)  bf16
    # b1_ref:  (1, ndh)       f32      w2_ref:  (ndh, 128)      bf16 (col 0 real)
    # b2_ref:  (1, 128)       f32      out_ref: (tm, 128)       f32 (col 0 real)
    xb = x_ref[...].astype(jnp.bfloat16)
    ab = att_ref[...].astype(jnp.bfloat16)

    # fc1 with the torch.cat fused as two dots into one f32 accumulator,
    # bias folded into the same accumulation expression.
    h1 = (jnp.dot(xb, w1x_ref[...], preferred_element_type=jnp.float32)
          + jnp.dot(ab, w1a_ref[...], preferred_element_type=jnp.float32)
          + b1_ref[...])
    # LeakyReLU(0.2) in f32 on the f32 accumulator (fast path on all chips).
    h1 = jnp.where(h1 > 0, h1, 0.2 * h1)

    # fc2 (lane-padded to 128 output columns) + sigmoid.
    logits = (jnp.dot(h1.astype(jnp.bfloat16), w2_ref[...],
                      preferred_element_type=jnp.float32)
              + b2_ref[...])
    out_ref[...] = (1.0 / (1.0 + jnp.exp(-logits))).astype(out_ref.dtype)


def mlp_d_forward(x, att, params):
    """x: (B, resSize) f32, att: (B, attSize) f32 -> (B, 1) f32 (sigmoid scores)."""
    w1_x, w1_a, b1, w2, b2 = params
    B, res_size = x.shape
    att_size = att.shape[1]
    ndh = w1_x.shape[1]
    out_pad = w2.shape[1]

    # Batch tiling: up to 256 rows per block (one full v6e/v7x MXU tile of M).
    if B % 256 == 0:
        tm = 256
    elif B % 128 == 0:
        tm = 128
    else:
        tm = B  # small / ragged batch -> single M block
    grid = (B // tm,)

    rep = lambda i: (0, 0)  # weights/biases replicated across the batch grid
    in_specs = [
        pl.BlockSpec((tm, res_size), lambda i: (i, 0)),
        pl.BlockSpec((tm, att_size), lambda i: (i, 0)),
        pl.BlockSpec((res_size, ndh), rep),
        pl.BlockSpec((att_size, ndh), rep),
        pl.BlockSpec((1, ndh), rep),
        pl.BlockSpec((ndh, out_pad), rep),
        pl.BlockSpec((1, out_pad), rep),
    ]
    out_spec = pl.BlockSpec((tm, out_pad), lambda i: (i, 0))

    cost = pl.CostEstimate(
        flops=2 * B * (res_size + att_size) * ndh + 2 * B * ndh * out_pad,
        transcendentals=B * out_pad,  # sigmoid exp
        bytes_accessed=(x.size * x.dtype.itemsize
                        + att.size * att.dtype.itemsize
                        + (w1_x.size + w1_a.size + w2.size) * 2   # bf16 weights
                        + (b1.size + b2.size) * 4
                        + B * out_pad * 4),
    )

    out_padded = pl.pallas_call(
        mlp_d_kernel,
        out_shape=jax.ShapeDtypeStruct((B, out_pad), jnp.float32),
        grid=grid,
        in_specs=in_specs,
        out_specs=out_spec,
        compiler_params=pltpu.CompilerParams(dimension_semantics=("parallel",)),
        cost_estimate=cost,
    )(x, att, w1_x, w1_a, b1, w2, b2)

    # Only lane 0 of the padded output is the real fc2 column.
    return out_padded[:, :1]


def init_params(key, res_size, att_size, ndh, out_pad=_LANE):
    """weights_init: Linear W ~ N(0, 0.02), b = 0.  Returns kernel-ready params:
       w1_x (resSize,ndh) bf16, w1_a (attSize,ndh) bf16, b1 (1,ndh) f32,
       w2 (ndh,out_pad) bf16 (real fc2 weight in col 0), b2 (1,out_pad) f32."""
    k1, k2 = jax.random.split(key)
    w1 = 0.02 * jax.random.normal(k1, (res_size + att_size, ndh), dtype=jnp.float32)
    w2_col = 0.02 * jax.random.normal(k2, (ndh,), dtype=jnp.float32)

    w1_x = w1[:res_size].astype(jnp.bfloat16)
    w1_a = w1[res_size:].astype(jnp.bfloat16)
    b1 = jnp.zeros((1, ndh), dtype=jnp.float32)
    w2 = jnp.zeros((ndh, out_pad), dtype=jnp.bfloat16).at[:, 0].set(
        w2_col.astype(jnp.bfloat16))
    b2 = jnp.zeros((1, out_pad), dtype=jnp.float32)
    return w1_x, w1_a, b1, w2, b2


if __name__ == "__main__":
    # Small, forward-consistent shapes: opt.resSize=128, opt.attSize=64, opt.ndh=128.
    B, RES, ATT, NDH = 16, 128, 64, 128

    key = jax.random.PRNGKey(0)
    kx, ka, kp = jax.random.split(key, 3)
    x = jax.random.normal(kx, (B, RES), dtype=jnp.float32)
    att = jax.random.normal(ka, (B, ATT), dtype=jnp.float32)
    params = init_params(kp, RES, ATT, NDH)

    out = mlp_d_forward(x, att, params)
    jax.block_until_ready(out)

    # Pure-JAX reference of the same math (bf16 operands, f32 accumulate).
    w1_x, w1_a, b1, w2, b2 = params
    xb = x.astype(jnp.bfloat16)
    ab = att.astype(jnp.bfloat16)
    h1 = (jnp.dot(xb, w1_x, preferred_element_type=jnp.float32)
          + jnp.dot(ab, w1_a, preferred_element_type=jnp.float32) + b1)
    h1 = jnp.where(h1 > 0, h1, 0.2 * h1)
    logits = jnp.dot(h1.astype(jnp.bfloat16), w2,
                     preferred_element_type=jnp.float32) + b2
    expected = (1.0 / (1.0 + jnp.exp(-logits)))[:, :1]

    assert out.shape == (B, 1)
    assert jnp.allclose(out, expected, atol=1e-3, rtol=1e-3)

    print("KERNEL_OK")
</pallas_src>

<mosaic_0001>
module attributes {stable_mosaic.version = 11 : i64} {
  func.func @mlp_d_kernel(%arg0: i32, %arg1: memref<16x128xf32, #tpu.memory_space<vmem>>, %arg2: memref<16x64xf32, #tpu.memory_space<vmem>>, %arg3: memref<128x128xbf16, #tpu.memory_space<vmem>>, %arg4: memref<64x128xbf16, #tpu.memory_space<vmem>>, %arg5: memref<1x128xf32, #tpu.memory_space<vmem>>, %arg6: memref<128x128xbf16, #tpu.memory_space<vmem>>, %arg7: memref<1x128xf32, #tpu.memory_space<vmem>>, %arg8: memref<16x128xf32, #tpu.memory_space<vmem>>) attributes {dimension_semantics = [#tpu.dimension_semantics<parallel>], iteration_bounds = array<i64: 1>, scalar_prefetch = 0 : i64, scratch_operands = 0 : i64, tpu.core_type = #tpu.core_type<tc>, window_params = [{transform_indices = @transform_0, window_bounds = array<i64: 16, 128>}, {transform_indices = @transform_1, window_bounds = array<i64: 16, 64>}, {pipeline_mode = #tpu.pipeline_mode<synchronous>, transform_indices = @transform_2, window_bounds = array<i64: 128, 128>}, {pipeline_mode = #tpu.pipeline_mode<synchronous>, transform_indices = @transform_3, window_bounds = array<i64: 64, 128>}, {pipeline_mode = #tpu.pipeline_mode<synchronous>, transform_indices = @transform_4, window_bounds = array<i64: 1, 128>}, {pipeline_mode = #tpu.pipeline_mode<synchronous>, transform_indices = @transform_5, window_bounds = array<i64: 128, 128>}, {pipeline_mode = #tpu.pipeline_mode<synchronous>, transform_indices = @transform_6, window_bounds = array<i64: 1, 128>}, {transform_indices = @transform_7, window_bounds = array<i64: 16, 128>}]} {
    %c0 = arith.constant 0 : index
    %c0_0 = arith.constant 0 : index
    %0 = vector.load %arg1[%c0, %c0_0] : memref<16x128xf32, #tpu.memory_space<vmem>>, vector<16x128xf32>
    %1 = arith.truncf %0 : vector<16x128xf32> to vector<16x128xbf16>
    %c0_1 = arith.constant 0 : index
    %c0_2 = arith.constant 0 : index
    %2 = vector.load %arg2[%c0_1, %c0_2] : memref<16x64xf32, #tpu.memory_space<vmem>>, vector<16x64xf32>
    %3 = arith.truncf %2 : vector<16x64xf32> to vector<16x64xbf16>
    %c0_3 = arith.constant 0 : index
    %c0_4 = arith.constant 0 : index
    %4 = vector.load %arg3[%c0_3, %c0_4] : memref<128x128xbf16, #tpu.memory_space<vmem>>, vector<128x128xbf16>
    %cst = arith.constant dense<0.000000e+00> : vector<16x128xf32>
    %5 = tpu.matmul %1, %4, %cst {dimension_numbers = #tpu.dot_dimension_numbers<[1], [0], [0], [1], [0, 0, 1, 1], [], []>} : vector<16x128xbf16>, vector<128x128xbf16>, vector<16x128xf32> -> vector<16x128xf32>
    %c0_5 = arith.constant 0 : index
    %c0_6 = arith.constant 0 : index
    %6 = vector.load %arg4[%c0_5, %c0_6] : memref<64x128xbf16, #tpu.memory_space<vmem>>, vector<64x128xbf16>
    %cst_7 = arith.constant dense<0.000000e+00> : vector<16x128xf32>
    %7 = tpu.matmul %3, %6, %cst_7 {dimension_numbers = #tpu.dot_dimension_numbers<[1], [0], [0], [1], [0, 0, 1, 1], [], []>} : vector<16x64xbf16>, vector<64x128xbf16>, vector<16x128xf32> -> vector<16x128xf32>
    %8 = arith.addf %5, %7 : vector<16x128xf32>
    %c0_8 = arith.constant 0 : index
    %c0_9 = arith.constant 0 : index
    %9 = vector.load %arg5[%c0_8, %c0_9] : memref<1x128xf32, #tpu.memory_space<vmem>>, vector<1x128xf32>
    %10 = vector.broadcast %9 : vector<1x128xf32> to vector<16x128xf32>
    %11 = arith.addf %8, %10 : vector<16x128xf32>
    %cst_10 = arith.constant 0.000000e+00 : f32
    %12 = vector.broadcast %cst_10 : f32 to vector<16x128xf32>
    %13 = arith.cmpf ogt, %11, %12 : vector<16x128xf32>
    %cst_11 = arith.constant 2.000000e-01 : f32
    %14 = vector.broadcast %cst_11 : f32 to vector<16x128xf32>
    %15 = arith.mulf %14, %11 : vector<16x128xf32>
    %16 = arith.select %13, %11, %15 : vector<16x128xi1>, vector<16x128xf32>
    %17 = arith.truncf %16 : vector<16x128xf32> to vector<16x128xbf16>
    %c0_12 = arith.constant 0 : index
    %c0_13 = arith.constant 0 : index
    %18 = vector.load %arg6[%c0_12, %c0_13] : memref<128x128xbf16, #tpu.memory_space<vmem>>, vector<128x128xbf16>
    %cst_14 = arith.constant dense<0.000000e+00> : vector<16x128xf32>
    %19 = tpu.matmul %17, %18, %cst_14 {dimension_numbers = #tpu.dot_dimension_numbers<[1], [0], [0], [1], [0, 0, 1, 1], [], []>} : vector<16x128xbf16>, vector<128x128xbf16>, vector<16x128xf32> -> vector<16x128xf32>
    %c0_15 = arith.constant 0 : index
    %c0_16 = arith.constant 0 : index
    %20 = vector.load %arg7[%c0_15, %c0_16] : memref<1x128xf32, #tpu.memory_space<vmem>>, vector<1x128xf32>
    %21 = vector.broadcast %20 : vector<1x128xf32> to vector<16x128xf32>
    %22 = arith.addf %19, %21 : vector<16x128xf32>
    %cst_17 = arith.constant 0.000000e+00 : f32
    %23 = vector.broadcast %cst_17 : f32 to vector<16x128xf32>
    %24 = arith.subf %23, %22 : vector<16x128xf32>
    %25 = math.exp %24 : vector<16x128xf32>
    %cst_18 = arith.constant 1.000000e+00 : f32
    %26 = vector.broadcast %cst_18 : f32 to vector<16x128xf32>
    %27 = arith.addf %26, %25 : vector<16x128xf32>
    %cst_19 = arith.constant 1.000000e+00 : f32
    %28 = vector.broadcast %cst_19 : f32 to vector<16x128xf32>
    %29 = arith.divf %28, %27 : vector<16x128xf32>
    %c0_20 = arith.constant 0 : index
    %c0_21 = arith.constant 0 : index
    %30 = vector.load %arg8[%c0_20, %c0_21] : memref<16x128xf32, #tpu.memory_space<vmem>>, vector<16x128xf32>
    tpu.vector_store %arg8[%c0_20, %c0_21], %29 {strides = array<i32>} : memref<16x128xf32, #tpu.memory_space<vmem>>, vector<16x128xf32>,
    return
  }
  func.func @transform_0(%arg0: i32) -> (i32, i32) {
    %c0_i32 = arith.constant 0 : i32
    %c0_i32_0 = arith.constant 0 : i32
    return %arg0, %c0_i32 : i32, i32
  }
  func.func @transform_1(%arg0: i32) -> (i32, i32) {
    %c0_i32 = arith.constant 0 : i32
    %c0_i32_0 = arith.constant 0 : i32
    return %arg0, %c0_i32 : i32, i32
  }
  func.func @transform_2(%arg0: i32) -> (i32, i32) {
    %c0_i32 = arith.constant 0 : i32
    %c0_i32_0 = arith.constant 0 : i32
    %c0_i32_1 = arith.constant 0 : i32
    return %c0_i32, %c0_i32_0 : i32, i32
  }
  func.func @transform_3(%arg0: i32) -> (i32, i32) {
    %c0_i32 = arith.constant 0 : i32
    %c0_i32_0 = arith.constant 0 : i32
    %c0_i32_1 = arith.constant 0 : i32
    return %c0_i32, %c0_i32_0 : i32, i32
  }
  func.func @transform_4(%arg0: i32) -> (i32, i32) {
    %c0_i32 = arith.constant 0 : i32
    %c0_i32_0 = arith.constant 0 : i32
    %c0_i32_1 = arith.constant 0 : i32
    return %c0_i32, %c0_i32_0 : i32, i32
  }
  func.func @transform_5(%arg0: i32) -> (i32, i32) {
    %c0_i32 = arith.constant 0 : i32
    %c0_i32_0 = arith.constant 0 : i32
    %c0_i32_1 = arith.constant 0 : i32
    return %c0_i32, %c0_i32_0 : i32, i32
  }
  func.func @transform_6(%arg0: i32) -> (i32, i32) {
    %c0_i32 = arith.constant 0 : i32
    %c0_i32_0 = arith.constant 0 : i32
    %c0_i32_1 = arith.constant 0 : i32
    return %c0_i32, %c0_i32_0 : i32, i32
  }
  func.func @transform_7(%arg0: i32) -> (i32, i32) {
    %c0_i32 = arith.constant 0 : i32
    %c0_i32_0 = arith.constant 0 : i32
    return %arg0, %c0_i32 : i32, i32
  }
}

</mosaic_0001>

<bundles_post_ra>
// kernel: tpu_custom_call.1
= control target key start
LH: loop header
LB: loop body
LE: loop exit
PB: predicated region body
PF: predicated region fallthrough
CT: control target
= control target key end

     0   :  { %12 = vsyncpa [#allocation3], 0  ;;  %s752_s0 = inlined_call_operand.hbm [shape: f32[16,128], index: 0, kind: input, shape index: {}]   ;;  %s753_s1 = inlined_call_operand.hbm [shape: f32[16,64], index: 1, kind: input, shape index: {}]   ;;  %s754_s2 = inlined_call_operand.hbm [shape: bf16[128,128], index: 2, kind: input, shape index: {}]   ;;  %s755_s3 = inlined_call_operand.hbm [shape: bf16[64,128], index: 3, kind: input, shape index: {}]   ;;  %s756_s4 = inlined_call_operand.vmem [shape: f32[1,128], index: 4, kind: input, shape index: {}]   ;;  %s757_s5 = inlined_call_operand.hbm [shape: bf16[128,128], index: 5, kind: input, shape index: {}]   ;;  %s758_s6 = inlined_call_operand.vmem [shape: f32[1,128], index: 6, kind: input, shape index: {}]   ;;  %s759_s7 = inlined_call_operand.hbm [shape: f32[16,128], index: 7, kind: output, shape index: {}]  }
   0x1   :  { %13 = vsyncpa [#allocation6], 0 }
   0x2   :  { %14 = vsyncpa [#allocation9], 0 }
   0x3   :  { %15 = vsyncpa [#allocation4], 0  ;;  %s33_s26 = sshll.u32 %s753_s1, 4  ;;  %s669_s27 = smov [#allocation5]   ;;  %s34_s26 = int_to_ptr.hbm [resolvable:$true] %s33_s26 }
   0x4   :  { %s35_s28 = sshll.u32 %s669_s27, 4  ;;  %s670_s29 = smov 128   ;;  %s36_s28 = int_to_ptr.vmem [resolvable:$true] %s35_s28 }
   0x5   :  { %s671_s30 = smov 8   ;;  %s59_s10 = sshll.u32 %s755_s3, 4  ;;  %s60_s10 = int_to_ptr.hbm [resolvable:$true] %s59_s10 }
   0x6   :  { %41 = dma.hbm_to_vmem [thread:$0]  %s34_s26, 256, %s36_s28, [#allocation6], %s670_s29, %s670_s29, %s671_s30  }
   0x7   :  { %s672_s11 = smov [#allocation8]   ;;  %s20_s1 = sshll.u32 %s752_s0, 4  ;;  %s21_s1 = int_to_ptr.hbm [resolvable:$true] %s20_s1 }
   0x8   :  { %s61_s12 = sshll.u32 %s672_s11, 4  ;;  %s673_s15 = smov 64   ;;  %s62_s12 = int_to_ptr.vmem [resolvable:$true] %s61_s12 }
   0x9   :  { %s674_s16 = smov 4   ;;  %s46_s19 = sshll.u32 %s754_s2, 4  ;;  %s47_s19 = int_to_ptr.hbm [resolvable:$true] %s46_s19 }
   0xa   :  { %67 = dma.hbm_to_vmem [thread:$0]  %s60_s10, 512, %s62_s12, [#allocation9], %s673_s15, %s673_s15, %s674_s16  }
   0xb   :  { %s675_s20 = smov [#allocation2]   ;;  %s676_s3 = smov [#allocation7]  }
   0xc   :  { %s22_s21 = sshll.u32 %s675_s20, 4  ;;  %s48_s22 = sshll.u32 %s676_s3, 4  ;;  %s23_s21 = int_to_ptr.vmem [resolvable:$true] %s22_s21  ;;  %s49_s22 = int_to_ptr.vmem [resolvable:$true] %s48_s22 }
   0xd   :  { %28 = dma.hbm_to_vmem [thread:$0]  %s21_s1, 256, %s23_s21, [#allocation3], %s670_s29, %s670_s29, %s671_s30  }
   0xe   :  { %s74_s24 = sshll.u32 %s757_s5, 4  ;;  %s677_s25 = smov [#allocation10]   ;;  %s75_s24 = int_to_ptr.hbm [resolvable:$true] %s74_s24 }
   0xf   :  { %54 = dma.hbm_to_vmem [thread:$0]  %s47_s19, 1024, %s49_s22, [#allocation6], %s673_s15, %s673_s15, %s674_s16  }
  0x10   :  { %s76_s26 = sshll.u32 %s677_s25, 4  ;;  %s77_s26 = int_to_ptr.vmem [resolvable:$true] %s76_s26 }
  0x11   :  { %82 = dma.hbm_to_vmem [thread:$0]  %s75_s24, 1024, %s77_s26, [#allocation9], %s673_s15, %s673_s15, %s674_s16  }
  0x12   :  { %661 = dma.done.wait [#allocation3], 256  }
  0x13   :  { %662 = vsyncadd [#allocation3], 4294967040 }
  0x14   :  { %663 = dma.done.wait [#allocation6], 1280  }
  0x15   :  { %664 = vsyncadd [#allocation6], 4294966016 }
  0x16   :  { %665 = dma.done.wait [#allocation9], 1536  }
  0x17   :  { %666 = vsyncadd [#allocation9], 4294965760  ;;  %v484_v0 = vld [vmem:[#allocation7 + $0x38] sm:$0xff]  ;;  %v483_v2 = vld [vmem:[#allocation7 + $0x30] sm:$0xff]  ;;  %vm160_vm0 = vcmask 523264   ;;  %s381_s10 = sshll.u32 %s759_s7, 4  ;;  %s382_s10 = int_to_ptr.hbm [resolvable:$true] %s381_s10 }
  0x18   :  { %v488_v1 = vld [vmem:[#allocation8 + $0x18] sm:$0xff]  ;;  %226 = vmatpush.bf16.msra.mxu1 %v484_v0  ;;  %v487_v3 = vld [vmem:[#allocation8 + $0x10] sm:$0xff]  ;;  %v482_v4 = vld [vmem:[#allocation7 + $0x28] sm:$0xff] }
  0x19   :  { %168 = vmatpush.bf16.msra.mxu0 %v488_v1  ;;  %v496_v5 = vld [vmem:[#allocation10 + $0x38] sm:$0xff]  ;;  %v486_v6 = vld [vmem:[#allocation8 + $0x8] sm:$0xff]  ;;  %v495_v7 = vld [vmem:[#allocation10 + $0x30] sm:$0xff] }
  0x1a   :  { %321 = vmatpush.bf16.msra.mxu2 %v496_v5  ;;  %v481_v8 = vld [vmem:[#allocation7 + $0x20] sm:$0xff]  ;;  %v109_v10 = vld [vmem:[#allocation5] sm:$0xff]  ;;  %v110_v11 = vld [vmem:[#allocation5 + $0x8] sm:$0xff] }
  0x1b   :  { %v485_v9 = vld [vmem:[#allocation8] sm:$0xff]  ;;  %v111_v12 = vpack.c.bf16 %v110_v11, %v109_v10  ;;  %v480_v13 = vld [vmem:[#allocation7 + $0x18] sm:$0xff]  ;;  %v479_v14 = vld [vmem:[#allocation7 + $0x10] sm:$0xff] }
  0x1c   :  { %227 = vmatpush.bf16.msra.mxu1 %v483_v2  ;;  %v478_v15 = vld [vmem:[#allocation7 + $0x8] sm:$0xff]  ;;  %v477_v16 = vld [vmem:[#allocation7] sm:$0xff]  ;;  %v492_v22 = vld [vmem:[#allocation10 + $0x18] sm:$0xff] }
  0x1d   :  { %169 = vmatpush.bf16.msra.mxu0 %v487_v3  ;;  %v106_v17 = vld [vmem:[#allocation2] sm:$0xff]  ;;  %v107_v18 = vld [vmem:[#allocation2 + $0x8] sm:$0xff]  ;;  %v491_v23 = vld [vmem:[#allocation10 + $0x10] sm:$0xff] }
  0x1e   :  { %322 = vmatpush.bf16.msra.mxu2 %v495_v7  ;;  %v108_v19 = vpack.c.bf16 %v107_v18, %v106_v17  ;;  %v494_v20 = vld [vmem:[#allocation10 + $0x28] sm:$0xff]  ;;  %v493_v21 = vld [vmem:[#allocation10 + $0x20] sm:$0xff] }
  0x1f   :  { %v490_v24 = vld [vmem:[#allocation10 + $0x8] sm:$0xff]  ;;  %v489_v25 = vld [vmem:[#allocation10] sm:$0xff] }
  0x20   :  { %228 = vmatpush.bf16.msra.mxu1 %v482_v4  ;;  %v507_v29 = vld [vmem:[%s756_s4] ss:$0 sm:$0xff]  ;;  %s678_s4 = smov [#allocation11]  }
  0x21   :  { %170 = vmatpush.bf16.msra.mxu0 %v486_v6  ;;  %v508_v40 = vld [vmem:[%s758_s6] ss:$0 sm:$0xff]  ;;  %s379_s6 = sshll.u32 %s678_s4, 4  ;;  %s380_s6 = int_to_ptr.vmem [resolvable:$true] %s379_s6 }
  0x22   :  { %323 = vmatpush.bf16.msra.mxu2 %v494_v20 }
  0x24   :  { %229 = vmatpush.bf16.msra.mxu1 %v481_v8 }
  0x25   :  { %171 = vmatpush.bf16.msra.mxu0 %v485_v9 }
  0x26   :  { %324 = vmatpush.bf16.msra.mxu2 %v493_v21 }
  0x28   :  { %412 = vmatmul.msk.bf16.vlgmr.msra.gmra.mxu0 %vm160_vm0, %v111_v12  ;;  %230 = vmatpush.bf16.msra.mxu1 %v480_v13 }
  0x2a   :  { %325 = vmatpush.bf16.msra.mxu2 %v492_v22 }
  0x2c   :  { %231 = vmatpush.bf16.msra.mxu1 %v479_v14 }
  0x2e   :  { %326 = vmatpush.bf16.msra.mxu2 %v491_v23 }
  0x30   :  { %232 = vmatpush.bf16.msra.mxu1 %v478_v15 }
  0x32   :  { %327 = vmatpush.bf16.msra.mxu2 %v490_v24 }
  0x34   :  { %233 = vmatpush.bf16.msra.mxu1 %v477_v16 }
  0x36   :  { %328 = vmatpush.bf16.msra.mxu2 %v489_v25 }
  0x37   :  { %234 = vmatmul.bf16.vlgmr.msra.gmra.mxu1 %v108_v19 }
  0xa5   :  { %v173_v26 = vpop.f32.mrf.mxu0 }
  0xad   :  { %v175_v31 = vpop.f32.mrf.mxu0 }
  0xb4   :  { %v235_v27 = vpop.f32.mrf.mxu1 }
  0xb5   :  { %v236_v28 = vadd.f32 %v235_v27, %v173_v26 }
  0xb7   :  { %v244_v30 = vadd.f32 %v507_v29, %v236_v28 }
  0xb9   :  { %v248_v35 = vmul.f32 0.2, %v244_v30  ;;  %vm246_vm1 = vcmp.gt.f32.partialorder %v244_v30, 0.0 }
  0xbb   :  { %v250_v37 = vsel %vm246_vm1, %v244_v30, %v248_v35 }
  0xbc   :  { %v237_v32 = vpop.f32.mrf.mxu1 }
  0xbd   :  { %v238_v33 = vadd.f32 %v237_v32, %v175_v31 }
  0xbf   :  { %v245_v34 = vadd.f32 %v507_v29, %v238_v33 }
  0xc1   :  { %vm247_vm2 = vcmp.gt.f32.partialorder %v245_v34, 0.0  ;;  %v249_v36 = vmul.f32 0.2, %v245_v34 }
  0xc3   :  { %v251_v38 = vsel %vm247_vm2, %v245_v34, %v249_v36 }
  0xc4   :  { %v252_v39 = vpack.c.bf16 %v251_v38, %v250_v37 }
  0xc6   :  { %329 = vmatmul.bf16.vlgmr.msra.gmra.mxu2 %v252_v39 }
 0x149   :  { %v330_v41 = vpop.f32.mrf.mxu2 }
 0x14a   :  { %v331_v42 = vadd.f32 %v508_v40, %v330_v41 }
 0x14c   :  { %v335_v43 = vsub.f32 0.0, %v331_v42 }
 0x14e   :  { %v337_v44 = vmul.f32 1.442695, %v335_v43 }
 0x150   :  { %509 = vpow2.f32 %v337_v44 }
 0x151   :  { %v332_v45 = vpop.f32.mrf.mxu2 }
 0x152   :  { %v333_v46 = vadd.f32 %v508_v40, %v332_v45 }
 0x154   :  { %v336_v47 = vsub.f32 0.0, %v333_v46 }
 0x156   :  { %v510_v48 = vpop.eup %509  ;;  %v339_v49 = vmul.f32 1.442695, %v336_v47 }
 0x157   :  { %v341_v50 = vadd.f32 1.0, %v510_v48 }
 0x158   :  { %511 = vpow2.f32 %v339_v49 }
 0x159   :  { %513 = vrcp.f32 %v341_v50  ;;  %v354_v56 = vand.u32 2147483648, %v341_v50  ;;  %v352_v58 = vand.u32 2147483647, %v341_v50  ;;  %vm348_vm4 = vweird.f32 %v341_v50 }
 0x15b   :  { %v355_v61 = vor.u32 1.1754944e-38, %v354_v56  ;;  %vm353_vm6 = vcmp.eq.f32.partialorder %v352_v58, 8.507059e+37 }
 0x15e   :  { %v512_v51 = vpop.eup %511 }
 0x15f   :  { %v514_v52 = vpop.eup %513  ;;  %v342_v53 = vadd.f32 1.0, %v512_v51 }
 0x160   :  { %v344_v54 = vmul.f32 %v514_v52, %v341_v50  ;;  %vm349_vm3 = vweird.f32 %v514_v52 }
 0x161   :  { %515 = vrcp.f32 %v342_v53  ;;  %vm350_vm5 = vmor %vm348_vm4, %vm349_vm3  ;;  %v369_v2 = vand.u32 2147483648, %v342_v53  ;;  %v367_v4 = vand.u32 2147483647, %v342_v53  ;;  %vm363_vm8 = vweird.f32 %v342_v53 }
 0x162   :  { %v345_v55 = vsub.f32 1.0, %v344_v54 }
 0x163   :  { %v370_v6 = vor.u32 1.1754944e-38, %v369_v2  ;;  %vm368_vm10 = vcmp.eq.f32.partialorder %v367_v4, 8.507059e+37 }
 0x164   :  { %v346_v57 = vmul.f32 %v514_v52, %v345_v55 }
 0x166   :  { %v347_v59 = vadd.f32 %v514_v52, %v346_v57 }
 0x167   :  { %v516_v60 = vpop.eup %515 }
 0x168   :  { %v359_v62 = vmul.f32 %v516_v60, %v342_v53  ;;  %v351_v63 = vsel %vm350_vm5, %v514_v52, %v347_v59  ;;  %vm364_vm7 = vweird.f32 %v516_v60 }
 0x169   :  { %v356_v0 = vsel %vm353_vm6, %v355_v61, %v351_v63  ;;  %vm365_vm9 = vmor %vm363_vm8, %vm364_vm7 }
 0x16a   :  { %v360_v1 = vsub.f32 1.0, %v359_v62  ;;  %373 = vst [vmem:[#allocation11] sm:$0xff] %v356_v0 }
 0x16c   :  { %v361_v3 = vmul.f32 %v516_v60, %v360_v1 }
 0x16e   :  { %v362_v5 = vadd.f32 %v516_v60, %v361_v3 }
 0x170   :  { %v366_v7 = vsel %vm365_vm9, %v516_v60, %v362_v5 }
 0x171   :  { %v371_v8 = vsel %vm368_vm10, %v370_v6, %v366_v7 }
 0x172   :  { %374 = vst [vmem:[#allocation11 + $0x8] sm:$0xff] %v371_v8 }
 0x173   :  { %387 = dma.vmem_to_hbm [thread:$0]  %s380_s6, 256, %s382_s10, [#allocation4], %s670_s29, %s670_s29, %s671_s30  }
 0x174   :  { %667 = dma.done.wait [#allocation4], 256  }
 0x175   :  { %668 = vsyncadd [#allocation4], 4294967040 }
 0x176   :  { %392 = vsyncpa [#allocation3], 1 }
 0x177   :  { %393 = vsyncpa [#allocation6], 1 }
 0x178   :  { %394 = vsyncpa [#allocation9], 1 }
 0x179   :  { %395 = vsyncpa [#allocation4], 1 }

</bundles_post_ra>
